<compile_context>
chip_gen: v5e
topology: v5e:2x2
jax: 0.10.0
libtpu: 0.0.40
codegen_flags: <defaults>
</compile_context>

<pallas_src>
import jax
import jax.numpy as jnp
from jax.experimental import pallas as pl
from jax.experimental.pallas import tpu as pltpu

EPS = 1e-5          # BatchNorm eps (PyTorch default)
NEG_SLOPE = 0.01    # LeakyReLU negative_slope (PyTorch default)


def _round_up(v, m):
    return (v + m - 1) // m * m


def _leaky_relu(x):
    return jnp.where(x > 0, x, NEG_SLOPE * x)


# ---------------------------------------------------------------------------
# Kernel: grid = (batch tiles, point chunks).  One program handles TB batch
# elements x TN points of the conv trunk; the FC head runs on the last chunk.
#   x_ref   : (TB, TN, K)  f32   channels-last point chunk
#   w_ref   : (5, C, C)    bf16  conv2/conv3/fc1/fc2/pose weights (zero padded)
#   fb_ref  : (R, C)       f32   rows [0:K) = conv1 weight, rows K..K+5 = biases
#   o_ref   : (TB, C)      f32   pose output; first k*k lanes are valid
#   gmax_ref: (TB, C)      f32   running max-pool accumulator (scratch)
# ---------------------------------------------------------------------------
def tnet_kernel(x_ref, w_ref, fb_ref, o_ref, gmax_ref):
    j = pl.program_id(1)
    TB, TN, K = x_ref.shape
    C = w_ref.shape[-1]

    fb = fb_ref[...]                               # (R, C)     f32
    x = x_ref[...].reshape(TB * TN, K)             # (TB*TN, K) f32

    def dense(a, layer, act):
        # bf16 operands, f32 MXU accumulation; bias / activation in f32.
        y = jnp.dot(a.astype(jnp.bfloat16), w_ref[layer],
                    preferred_element_type=jnp.float32)
        y = y + fb[K + 1 + layer:K + 2 + layer, :]
        return _leaky_relu(y) if act else y

    # conv1 (K -> E): tiny K=3 contraction, kept in f32 (carries <5% of FLOPs).
    h = _leaky_relu(
        jnp.dot(x, fb[:K, :], preferred_element_type=jnp.float32)
        + fb[K:K + 1, :])
    h = dense(h, 0, True)      # conv2 + BN(folded) + LeakyReLU
    h = dense(h, 1, False)     # conv3 + BN(folded), no activation

    # Partial global max-pool over this chunk's TN points, per batch element.
    part = jnp.max(h.reshape(TB, TN, C), axis=1)   # (TB, C)

    @pl.when(j == 0)
    def _():
        gmax_ref[...] = part

    @pl.when(j != 0)
    def _():
        gmax_ref[...] = jnp.maximum(gmax_ref[...], part)

    # FC head fires once per batch tile, on the final point chunk.
    @pl.when(j == pl.num_programs(1) - 1)
    def _():
        g = gmax_ref[...]
        g = dense(g, 2, True)          # fc1 + BN(folded) + LeakyReLU
        g = dense(g, 3, True)          # fc2 + BN(folded) + LeakyReLU
        o_ref[...] = dense(g, 4, False)  # pose (identity folded into its bias)


# ---------------------------------------------------------------------------
# Host-side parameter construction / folding / packing
# ---------------------------------------------------------------------------
def init_params(key, k, embed_dim):
    """Deterministic synthetic parameters matching TNet.__init__ shapes."""
    e = embed_dim
    keys = iter(jax.random.split(key, 64))

    def lin(cin, cout):
        w = 0.1 * jax.random.normal(next(keys), (cout, cin), jnp.float32)
        b = 0.1 * jax.random.normal(next(keys), (cout,), jnp.float32)
        return w, b

    def bn(c):
        gamma = 1.0 + 0.1 * jax.random.normal(next(keys), (c,), jnp.float32)
        beta = 0.1 * jax.random.normal(next(keys), (c,), jnp.float32)
        mean = 0.1 * jax.random.normal(next(keys), (c,), jnp.float32)
        var = jnp.abs(jax.random.normal(next(keys), (c,), jnp.float32)) + 0.5
        return gamma, beta, mean, var

    return {
        "conv": [(*lin(k, e), bn(e)),
                 (*lin(e, 2 * e), bn(2 * e)),
                 (*lin(2 * e, 4 * e), bn(4 * e))],
        "fc": [(*lin(4 * e, 2 * e), bn(2 * e)),
               (*lin(2 * e, e), bn(e))],
        "pose": lin(e, k * k),
    }


def fold_params(params, k):
    """Fold eval-mode BN into the matmuls; fold the identity into pose bias.

    Returns six (w (Cin, Cout) f32, b (Cout,) f32) layers in order:
    conv1, conv2, conv3, fc1, fc2, pose.
    """
    def fold(w, b, bnp):
        g, bt, m, v = bnp
        s = g / jnp.sqrt(v + EPS)
        return (w * s[:, None]).T, (b - m) * s + bt

    layers = [fold(w, b, bnp) for (w, b, bnp) in params["conv"] + params["fc"]]
    wp, bp = params["pose"]
    layers.append((wp.T, bp + jnp.eye(k, dtype=jnp.float32).flatten()))
    return layers


def pack_params(folded, k):
    """Pack the 6 layers into two lane-dense slabs (fewer, denser DMAs)."""
    couts = [w.shape[1] for (w, _) in folded]
    C = _round_up(max(max(couts), 128), 128)     # all intermediates C lanes wide

    ws = []
    for (w, _) in folded[1:]:                    # conv2, conv3, fc1, fc2, pose
        cin, cout = w.shape
        ws.append(jnp.zeros((C, C), jnp.float32).at[:cin, :cout].set(w))
    wstack = jnp.stack(ws).astype(jnp.bfloat16)  # (5, C, C)

    K = k
    R = _round_up(K + 6, 8)
    fb = jnp.zeros((R, C), jnp.float32)
    w1, _ = folded[0]
    fb = fb.at[:K, :w1.shape[1]].set(w1)
    for l, (_, b) in enumerate(folded):
        fb = fb.at[K + l, :b.shape[0]].set(b)
    return wstack, fb, C


def tnet_pallas(x_ncl, params, k, max_tb=32, max_tn=128):
    """TNet forward; x_ncl is the PyTorch-layout (B, k, N) input."""
    B, K, N = x_ncl.shape
    assert K == k
    folded = fold_params(params, k)
    wstack, fb, C = pack_params(folded, k)

    # Channels-last (B, N, K): points land on sublanes so every conv/FC
    # intermediate inside the kernel is a lane-dense (TB*TN, C) / (TB, C) tile.
    x = jnp.transpose(x_ncl, (0, 2, 1)).astype(jnp.float32)

    # Point-axis chunking: bounds per-step VMEM; pad N by edge replication
    # (duplicated points never change the max-pool result).
    TN = _round_up(N, 8) if N <= max_tn else max_tn
    N_pad = _round_up(N, TN)
    if N_pad != N:
        x = jnp.pad(x, ((0, 0), (0, N_pad - N), (0, 0)), mode="edge")

    # Batch tiling: amortise per-step overhead / weight DMAs, M = TB rows.
    if B <= max_tb:
        TB, B_pad = B, B                          # batch axis = single step
    else:
        TB = max_tb                               # multiple of 8
        B_pad = _round_up(B, TB)
        x = jnp.pad(x, ((0, B_pad - B), (0, 0), (0, 0)))

    out = pl.pallas_call(
        tnet_kernel,
        out_shape=jax.ShapeDtypeStruct((B_pad, C), jnp.float32),
        grid=(B_pad // TB, N_pad // TN),
        in_specs=[
            pl.BlockSpec((TB, TN, K), lambda i, j: (i, j, 0)),
            pl.BlockSpec(wstack.shape, lambda i, j: (0, 0, 0)),
            pl.BlockSpec(fb.shape, lambda i, j: (0, 0)),
        ],
        out_specs=pl.BlockSpec((TB, C), lambda i, j: (i, 0)),
        scratch_shapes=[pltpu.VMEM((TB, C), jnp.float32)],
        compiler_params=pltpu.CompilerParams(
            dimension_semantics=("parallel", "arbitrary")),
    )(x, wstack, fb)

    return out[:B, :k * k].reshape(B, k, k)


# ---------------------------------------------------------------------------
# References
# ---------------------------------------------------------------------------
def tnet_ref(x_ncl, params, k):
    """Pure-f32 JAX reference of the PyTorch eval-mode forward."""
    def bn_apply(y, bnp):
        g, bt, m, v = bnp
        shape = (1, -1, 1) if y.ndim == 3 else (1, -1)
        return (g.reshape(shape) * (y - m.reshape(shape))
                / jnp.sqrt(v.reshape(shape) + EPS) + bt.reshape(shape))

    def conv1d(y, w, b):                 # y: (B, Cin, N), w: (Cout, Cin)
        return jnp.einsum("oc,bcn->bon", w, y) + b.reshape(1, -1, 1)

    (w1, b1, bn1), (w2, b2, bn2), (w3, b3, bn3) = params["conv"]
    h = jax.nn.leaky_relu(bn_apply(conv1d(x_ncl, w1, b1), bn1), NEG_SLOPE)
    h = jax.nn.leaky_relu(bn_apply(conv1d(h, w2, b2), bn2), NEG_SLOPE)
    h = bn_apply(conv1d(h, w3, b3), bn3)
    g = jnp.max(h, axis=2)
    (w4, b4, bn4), (w5, b5, bn5) = params["fc"]
    f = jax.nn.leaky_relu(bn_apply(g @ w4.T + b4, bn4), NEG_SLOPE)
    f = jax.nn.leaky_relu(bn_apply(f @ w5.T + b5, bn5), NEG_SLOPE)
    wp, bp = params["pose"]
    p = f @ wp.T + bp + jnp.eye(k, dtype=jnp.float32).flatten()
    return p.reshape(-1, k, k)


def tnet_mixed_ref(x_ncl, folded, k):
    """Pure-JAX model of the kernel numerics (bf16 matmul operands, f32 acc)."""
    (w1, b1), (w2, b2), (w3, b3), (w4, b4), (w5, b5), (wp, bp) = folded
    x = jnp.transpose(x_ncl, (0, 2, 1)).astype(jnp.float32)      # (B, N, K)

    def mm(a, w):
        return jnp.dot(a.astype(jnp.bfloat16), w.astype(jnp.bfloat16),
                       preferred_element_type=jnp.float32)

    h = _leaky_relu(jnp.einsum("bnk,ke->bne", x, w1) + b1)       # conv1 in f32
    h = _leaky_relu(mm(h, w2) + b2)
    h = mm(h, w3) + b3
    g = jnp.max(h, axis=1)
    f = _leaky_relu(mm(g, w4) + b4)
    f = _leaky_relu(mm(f, w5) + b5)
    p = mm(f, wp) + bp                     # identity already folded into bp
    return p.reshape(-1, k, k)


if __name__ == "__main__":
    k, embed_dim = 3, 32
    key = jax.random.PRNGKey(0)
    pkey, xkey = jax.random.split(key)
    params = init_params(pkey, k, embed_dim)
    folded = fold_params(params, k)

    # Three configs: single-step grid, multi-batch-tile grid with batch
    # padding, and a multi-point-chunk grid with edge-padded point axis.
    for (B, N) in [(4, 64), (40, 64), (4, 200)]:
        x = jax.random.normal(jax.random.fold_in(xkey, B * 1000 + N),
                              (B, k, N), jnp.float32)            # PyTorch NCL
        out = jax.block_until_ready(tnet_pallas(x, params, k))
        assert out.shape == (B, k, k)

        # Tight check vs. a reference with matching bf16/f32 mixed numerics.
        ref_mx = tnet_mixed_ref(x, folded, k)
        assert jnp.allclose(out, ref_mx, atol=1e-2, rtol=1e-2), \
            float(jnp.max(jnp.abs(out - ref_mx)))
        # Looser check vs. the pure-f32 PyTorch eval semantics (bf16 matmul
        # operands introduce ~1e-2 relative error).
        ref_32 = tnet_ref(x, params, k)
        assert jnp.allclose(out, ref_32, atol=5e-2, rtol=5e-2), \
            float(jnp.max(jnp.abs(out - ref_32)))

    print("KERNEL_OK")
</pallas_src>

<mosaic_0001>
module attributes {stable_mosaic.version = 11 : i64} {
  func.func @tnet_kernel(%arg0: i32, %arg1: i32, %arg2: memref<4x64x3xf32, #tpu.memory_space<vmem>>, %arg3: memref<5x128x128xbf16, #tpu.memory_space<vmem>>, %arg4: memref<16x128xf32, #tpu.memory_space<vmem>>, %arg5: memref<4x128xf32, #tpu.memory_space<vmem>>, %arg6: memref<4x128xf32, #tpu.memory_space<vmem>>) attributes {dimension_semantics = [#tpu.dimension_semantics<parallel>, #tpu.dimension_semantics<arbitrary>], iteration_bounds = array<i64: 1, 1>, scalar_prefetch = 0 : i64, scratch_operands = 1 : i64, tpu.core_type = #tpu.core_type<tc>, window_params = [{transform_indices = @transform_0, window_bounds = array<i64: 4, 64, 3>}, {pipeline_mode = #tpu.pipeline_mode<synchronous>, transform_indices = @transform_1, window_bounds = array<i64: 5, 128, 128>}, {pipeline_mode = #tpu.pipeline_mode<synchronous>, transform_indices = @transform_2, window_bounds = array<i64: 16, 128>}, {transform_indices = @transform_3, window_bounds = array<i64: 4, 128>}]} {
    %c0 = arith.constant 0 : index
    %c0_0 = arith.constant 0 : index
    %0 = vector.load %arg4[%c0, %c0_0] : memref<16x128xf32, #tpu.memory_space<vmem>>, vector<16x128xf32>
    %c0_1 = arith.constant 0 : index
    %c0_2 = arith.constant 0 : index
    %c0_3 = arith.constant 0 : index
    %1 = vector.load %arg2[%c0_1, %c0_2, %c0_3] : memref<4x64x3xf32, #tpu.memory_space<vmem>>, vector<4x64x3xf32>
    %2 = vector.shape_cast %1 : vector<4x64x3xf32> to vector<256x3xf32>
    %3 = vector.extract_strided_slice %0 {offsets = [0, 0], sizes = [3, 128], strides = [1, 1]} : vector<16x128xf32> to vector<3x128xf32>
    %cst = arith.constant dense<0.000000e+00> : vector<256x128xf32>
    %4 = tpu.matmul %2, %3, %cst {dimension_numbers = #tpu.dot_dimension_numbers<[1], [0], [0], [1], [0, 0, 1, 1], [], []>} : vector<256x3xf32>, vector<3x128xf32>, vector<256x128xf32> -> vector<256x128xf32>
    %5 = vector.extract_strided_slice %0 {offsets = [3, 0], sizes = [1, 128], strides = [1, 1]} : vector<16x128xf32> to vector<1x128xf32>
    %6 = vector.broadcast %5 : vector<1x128xf32> to vector<256x128xf32>
    %7 = arith.addf %4, %6 : vector<256x128xf32>
    %cst_4 = arith.constant 0.000000e+00 : f32
    %8 = vector.broadcast %cst_4 : f32 to vector<256x128xf32>
    %9 = arith.cmpf ogt, %7, %8 : vector<256x128xf32>
    %cst_5 = arith.constant 0.00999999977 : f32
    %10 = vector.broadcast %cst_5 : f32 to vector<256x128xf32>
    %11 = arith.mulf %10, %7 : vector<256x128xf32>
    %12 = arith.select %9, %7, %11 : vector<256x128xi1>, vector<256x128xf32>
    %13 = arith.truncf %12 : vector<256x128xf32> to vector<256x128xbf16>
    %c0_6 = arith.constant 0 : index
    %c0_7 = arith.constant 0 : index
    %c0_8 = arith.constant 0 : index
    %14 = vector.load %arg3[%c0_6, %c0_7, %c0_8] : memref<5x128x128xbf16, #tpu.memory_space<vmem>>, vector<1x128x128xbf16>
    %15 = vector.shape_cast %14 : vector<1x128x128xbf16> to vector<128x128xbf16>
    %cst_9 = arith.constant dense<0.000000e+00> : vector<256x128xf32>
    %16 = tpu.matmul %13, %15, %cst_9 {dimension_numbers = #tpu.dot_dimension_numbers<[1], [0], [0], [1], [0, 0, 1, 1], [], []>} : vector<256x128xbf16>, vector<128x128xbf16>, vector<256x128xf32> -> vector<256x128xf32>
    %17 = vector.extract_strided_slice %0 {offsets = [4, 0], sizes = [1, 128], strides = [1, 1]} : vector<16x128xf32> to vector<1x128xf32>
    %18 = vector.broadcast %17 : vector<1x128xf32> to vector<256x128xf32>
    %19 = arith.addf %16, %18 : vector<256x128xf32>
    %cst_10 = arith.constant 0.000000e+00 : f32
    %20 = vector.broadcast %cst_10 : f32 to vector<256x128xf32>
    %21 = arith.cmpf ogt, %19, %20 : vector<256x128xf32>
    %cst_11 = arith.constant 0.00999999977 : f32
    %22 = vector.broadcast %cst_11 : f32 to vector<256x128xf32>
    %23 = arith.mulf %22, %19 : vector<256x128xf32>
    %24 = arith.select %21, %19, %23 : vector<256x128xi1>, vector<256x128xf32>
    %25 = arith.truncf %24 : vector<256x128xf32> to vector<256x128xbf16>
    %c1 = arith.constant 1 : index
    %c0_12 = arith.constant 0 : index
    %c0_13 = arith.constant 0 : index
    %26 = vector.load %arg3[%c1, %c0_12, %c0_13] : memref<5x128x128xbf16, #tpu.memory_space<vmem>>, vector<1x128x128xbf16>
    %27 = vector.shape_cast %26 : vector<1x128x128xbf16> to vector<128x128xbf16>
    %cst_14 = arith.constant dense<0.000000e+00> : vector<256x128xf32>
    %28 = tpu.matmul %25, %27, %cst_14 {dimension_numbers = #tpu.dot_dimension_numbers<[1], [0], [0], [1], [0, 0, 1, 1], [], []>} : vector<256x128xbf16>, vector<128x128xbf16>, vector<256x128xf32> -> vector<256x128xf32>
    %29 = vector.extract_strided_slice %0 {offsets = [5, 0], sizes = [1, 128], strides = [1, 1]} : vector<16x128xf32> to vector<1x128xf32>
    %30 = vector.broadcast %29 : vector<1x128xf32> to vector<256x128xf32>
    %31 = arith.addf %28, %30 : vector<256x128xf32>
    %32 = vector.shape_cast %31 : vector<256x128xf32> to vector<4x64x128xf32>
    %cst_15 = arith.constant dense<0xFF800000> : vector<4x128xf32>
    %33 = vector.multi_reduction <maximumf>, %32, %cst_15 [1] : vector<4x64x128xf32> to vector<4x128xf32>
    %c0_i32 = arith.constant 0 : i32
    %34 = arith.cmpi eq, %arg1, %c0_i32 : i32
    %35 = arith.extui %34 : i1 to i32
    %c0_i32_16 = arith.constant 0 : i32
    %36 = arith.cmpi ne, %35, %c0_i32_16 : i32
    scf.if %36 {
      %c0_21 = arith.constant 0 : index
      %c0_22 = arith.constant 0 : index
      %43 = vector.load %arg6[%c0_21, %c0_22] : memref<4x128xf32, #tpu.memory_space<vmem>>, vector<4x128xf32>
      tpu.vector_store %arg6[%c0_21, %c0_22], %33 {strides = array<i32>} : memref<4x128xf32, #tpu.memory_space<vmem>>, vector<4x128xf32>,
    } else {
    }
    %c0_i32_17 = arith.constant 0 : i32
    %37 = arith.cmpi ne, %arg1, %c0_i32_17 : i32
    %38 = arith.extui %37 : i1 to i32
    %c0_i32_18 = arith.constant 0 : i32
    %39 = arith.cmpi ne, %38, %c0_i32_18 : i32
    scf.if %39 {
      %c0_21 = arith.constant 0 : index
      %c0_22 = arith.constant 0 : index
      %43 = vector.load %arg6[%c0_21, %c0_22] : memref<4x128xf32, #tpu.memory_space<vmem>>, vector<4x128xf32>
      %44 = arith.maximumf %43, %33 : vector<4x128xf32>
      %c0_23 = arith.constant 0 : index
      %c0_24 = arith.constant 0 : index
      %45 = vector.load %arg6[%c0_23, %c0_24] : memref<4x128xf32, #tpu.memory_space<vmem>>, vector<4x128xf32>
      tpu.vector_store %arg6[%c0_23, %c0_24], %44 {strides = array<i32>} : memref<4x128xf32, #tpu.memory_space<vmem>>, vector<4x128xf32>,
    } else {
    }
    %c0_i32_19 = arith.constant 0 : i32
    %40 = arith.cmpi eq, %arg1, %c0_i32_19 : i32
    %41 = arith.extui %40 : i1 to i32
    %c0_i32_20 = arith.constant 0 : i32
    %42 = arith.cmpi ne, %41, %c0_i32_20 : i32
    scf.if %42 {
      %c0_21 = arith.constant 0 : index
      %c0_22 = arith.constant 0 : index
      %43 = vector.load %arg6[%c0_21, %c0_22] : memref<4x128xf32, #tpu.memory_space<vmem>>, vector<4x128xf32>
      %44 = arith.truncf %43 : vector<4x128xf32> to vector<4x128xbf16>
      %c2 = arith.constant 2 : index
      %c0_23 = arith.constant 0 : index
      %c0_24 = arith.constant 0 : index
      %45 = vector.load %arg3[%c2, %c0_23, %c0_24] : memref<5x128x128xbf16, #tpu.memory_space<vmem>>, vector<1x128x128xbf16>
      %46 = vector.shape_cast %45 : vector<1x128x128xbf16> to vector<128x128xbf16>
      %cst_25 = arith.constant dense<0.000000e+00> : vector<4x128xf32>
      %47 = tpu.matmul %44, %46, %cst_25 {dimension_numbers = #tpu.dot_dimension_numbers<[1], [0], [0], [1], [0, 0, 1, 1], [], []>} : vector<4x128xbf16>, vector<128x128xbf16>, vector<4x128xf32> -> vector<4x128xf32>
      %48 = vector.extract_strided_slice %0 {offsets = [6, 0], sizes = [1, 128], strides = [1, 1]} : vector<16x128xf32> to vector<1x128xf32>
      %49 = vector.broadcast %48 : vector<1x128xf32> to vector<4x128xf32>
      %50 = arith.addf %47, %49 : vector<4x128xf32>
      %cst_26 = arith.constant 0.000000e+00 : f32
      %51 = vector.broadcast %cst_26 : f32 to vector<4x128xf32>
      %52 = arith.cmpf ogt, %50, %51 : vector<4x128xf32>
      %cst_27 = arith.constant 0.00999999977 : f32
      %53 = vector.broadcast %cst_27 : f32 to vector<4x128xf32>
      %54 = arith.mulf %53, %50 : vector<4x128xf32>
      %55 = arith.select %52, %50, %54 : vector<4x128xi1>, vector<4x128xf32>
      %56 = arith.truncf %55 : vector<4x128xf32> to vector<4x128xbf16>
      %c3 = arith.constant 3 : index
      %c0_28 = arith.constant 0 : index
      %c0_29 = arith.constant 0 : index
      %57 = vector.load %arg3[%c3, %c0_28, %c0_29] : memref<5x128x128xbf16, #tpu.memory_space<vmem>>, vector<1x128x128xbf16>
      %58 = vector.shape_cast %57 : vector<1x128x128xbf16> to vector<128x128xbf16>
      %cst_30 = arith.constant dense<0.000000e+00> : vector<4x128xf32>
      %59 = tpu.matmul %56, %58, %cst_30 {dimension_numbers = #tpu.dot_dimension_numbers<[1], [0], [0], [1], [0, 0, 1, 1], [], []>} : vector<4x128xbf16>, vector<128x128xbf16>, vector<4x128xf32> -> vector<4x128xf32>
      %60 = vector.extract_strided_slice %0 {offsets = [7, 0], sizes = [1, 128], strides = [1, 1]} : vector<16x128xf32> to vector<1x128xf32>
      %61 = vector.broadcast %60 : vector<1x128xf32> to vector<4x128xf32>
      %62 = arith.addf %59, %61 : vector<4x128xf32>
      %cst_31 = arith.constant 0.000000e+00 : f32
      %63 = vector.broadcast %cst_31 : f32 to vector<4x128xf32>
      %64 = arith.cmpf ogt, %62, %63 : vector<4x128xf32>
      %cst_32 = arith.constant 0.00999999977 : f32
      %65 = vector.broadcast %cst_32 : f32 to vector<4x128xf32>
      %66 = arith.mulf %65, %62 : vector<4x128xf32>
      %67 = arith.select %64, %62, %66 : vector<4x128xi1>, vector<4x128xf32>
      %68 = arith.truncf %67 : vector<4x128xf32> to vector<4x128xbf16>
      %c4 = arith.constant 4 : index
      %c0_33 = arith.constant 0 : index
      %c0_34 = arith.constant 0 : index
      %69 = vector.load %arg3[%c4, %c0_33, %c0_34] : memref<5x128x128xbf16, #tpu.memory_space<vmem>>, vector<1x128x128xbf16>
      %70 = vector.shape_cast %69 : vector<1x128x128xbf16> to vector<128x128xbf16>
      %cst_35 = arith.constant dense<0.000000e+00> : vector<4x128xf32>
      %71 = tpu.matmul %68, %70, %cst_35 {dimension_numbers = #tpu.dot_dimension_numbers<[1], [0], [0], [1], [0, 0, 1, 1], [], []>} : vector<4x128xbf16>, vector<128x128xbf16>, vector<4x128xf32> -> vector<4x128xf32>
      %72 = vector.extract_strided_slice %0 {offsets = [8, 0], sizes = [1, 128], strides = [1, 1]} : vector<16x128xf32> to vector<1x128xf32>
      %73 = vector.broadcast %72 : vector<1x128xf32> to vector<4x128xf32>
      %74 = arith.addf %71, %73 : vector<4x128xf32>
      %c0_36 = arith.constant 0 : index
      %c0_37 = arith.constant 0 : index
      %75 = vector.load %arg5[%c0_36, %c0_37] : memref<4x128xf32, #tpu.memory_space<vmem>>, vector<4x128xf32>
      tpu.vector_store %arg5[%c0_36, %c0_37], %74 {strides = array<i32>} : memref<4x128xf32, #tpu.memory_space<vmem>>, vector<4x128xf32>,
    } else {
    }
    return
  }
  func.func @transform_0(%arg0: i32, %arg1: i32) -> (i32, i32, i32) {
    %c0_i32 = arith.constant 0 : i32
    %c0_i32_0 = arith.constant 0 : i32
    return %arg0, %arg1, %c0_i32 : i32, i32, i32
  }
  func.func @transform_1(%arg0: i32, %arg1: i32) -> (i32, i32, i32) {
    %c0_i32 = arith.constant 0 : i32
    %c0_i32_0 = arith.constant 0 : i32
    %c0_i32_1 = arith.constant 0 : i32
    %c0_i32_2 = arith.constant 0 : i32
    return %c0_i32, %c0_i32_0, %c0_i32_1 : i32, i32, i32
  }
  func.func @transform_2(%arg0: i32, %arg1: i32) -> (i32, i32) {
    %c0_i32 = arith.constant 0 : i32
    %c0_i32_0 = arith.constant 0 : i32
    %c0_i32_1 = arith.constant 0 : i32
    return %c0_i32, %c0_i32_0 : i32, i32
  }
  func.func @transform_3(%arg0: i32, %arg1: i32) -> (i32, i32) {
    %c0_i32 = arith.constant 0 : i32
    %c0_i32_0 = arith.constant 0 : i32
    return %arg0, %c0_i32 : i32, i32
  }
}

</mosaic_0001>

<bundles_post_ra>
// kernel: tpu_custom_call.1
= control target key start
LH: loop header
LB: loop body
LE: loop exit
PB: predicated region body
PF: predicated region fallthrough
CT: control target
= control target key end

     0   :  { %8 = vsyncpa [#allocation4], 0  ;;  %s1748_s0 = inlined_call_operand.vmem [shape: f32[4,64,3], index: 0, kind: input, shape index: {}]   ;;  %s1749_s1 = inlined_call_operand.hbm [shape: bf16[5,128,128], index: 1, kind: input, shape index: {}]   ;;  %s1750_s2 = inlined_call_operand.vmem [shape: f32[16,128], index: 2, kind: input, shape index: {}]   ;;  %s1751_s3 = inlined_call_operand.hbm [shape: f32[4,128], index: 3, kind: output, shape index: {}]  }
   0x1   :  { %9 = vsyncpa [#allocation5], 0  ;;  %s16_s14 = sshll.u32 %s1749_s1, 4  ;;  %s1473_s15 = smov [#allocation3]   ;;  %s17_s14 = int_to_ptr.hbm [resolvable:$true] %s16_s14 }
   0x2   :  { %s18_s16 = sshll.u32 %s1473_s15, 4  ;;  %s1474_s17 = smov 64   ;;  %s19_s16 = int_to_ptr.vmem [resolvable:$true] %s18_s16 }
   0x3   :  { %s1475_s18 = smov 4  }
   0x4   :  { %24 = dma.hbm_to_vmem [thread:$0]  %s17_s14, 5120, %s19_s16, [#allocation4], %s1474_s17, %s1474_s17, %s1475_s18  }
   0x5   :  { %1469 = dma.done.wait [#allocation4], 5120  }
   0x6   :  { %1470 = vsyncadd [#allocation4], 4294962176  ;;  %vm163_vm0 = vcmask 1042432   ;;  %vm66_vm1 = vcmask 23552   ;;  %v1503_v0 = vld [vmem:[%s1750_s2] sm:$0xff]  ;;  %v34_v2 = vld [vmem:[%s1748_s0 + $0x8] sm:$0xff] }
   0x7   :  { %v33_v1 = vld [vmem:[%s1748_s0] sm:$0xff]  ;;  %1167 = vmatpush.msk.msra.mxu0 %vm163_vm0, %v1503_v0  ;;  %v35_v3 = vld [vmem:[%s1748_s0 + $0x10] sm:$0xff]  ;;  %v36_v4 = vld [vmem:[%s1748_s0 + $0x18] sm:$0xff]  ;;  %v1574_v27 = vperm.slane %v1503_v0, 3  ;;  %s1476_s4 = smov [#allocation6]   ;;  %s1157_s8 = sshll.u32 %s1751_s3, 4  ;;  %s1158_s8 = int_to_ptr.hbm [resolvable:$true] %s1157_s8 }
   0x8   :  { %1168 = vmatmul.msk.f32.vlgmr.msra.gmra.mxu0 %vm66_vm1, %v33_v1  ;;  %v37_v5 = vld [vmem:[%s1748_s0 + $0x20] sm:$0xff]  ;;  %v38_v6 = vld [vmem:[%s1748_s0 + $0x28] sm:$0xff]  ;;  %v39_v7 = vld [vmem:[%s1748_s0 + $0x30] sm:$0xff]  ;;  %s1155_s5 = sshll.u32 %s1476_s4, 4  ;;  %s1156_s5 = int_to_ptr.vmem [resolvable:$true] %s1155_s5 }
   0x9   :  { %v40_v8 = vld [vmem:[%s1748_s0 + $0x38] sm:$0xff]  ;;  %v41_v9 = vld [vmem:[%s1748_s0 + $0x40] sm:$0xff]  ;;  %v42_v10 = vld [vmem:[%s1748_s0 + $0x48] sm:$0xff] }
   0xa   :  { %v1367_v11 = vld [vmem:[#allocation3 + $0x38] sm:$0xff]  ;;  %v43_v12 = vld [vmem:[%s1748_s0 + $0x50] sm:$0xff]  ;;  %v1364_v16 = vld [vmem:[#allocation3 + $0x20] sm:$0xff] }
   0xb   :  { %457 = vmatpush.bf16.msra.mxu1 %v1367_v11  ;;  %1400 = vmatpush.bf16.msra.mxu3 %v1367_v11  ;;  %v1366_v13 = vld [vmem:[#allocation3 + $0x30] sm:$0xff]  ;;  %v1365_v14 = vld [vmem:[#allocation3 + $0x28] sm:$0xff]  ;;  %v1363_v17 = vld [vmem:[#allocation3 + $0x18] sm:$0xff] }
   0xc   :  { %v44_v15 = vld [vmem:[%s1748_s0 + $0x58] sm:$0xff]  ;;  %v45_v18 = vld [vmem:[%s1748_s0 + $0x60] sm:$0xff]  ;;  %v1361_v20 = vld [vmem:[#allocation3 + $0x8] sm:$0xff] }
   0xd   :  { %v1362_v19 = vld [vmem:[#allocation3 + $0x10] sm:$0xff]  ;;  %v46_v21 = vld [vmem:[%s1748_s0 + $0x68] sm:$0xff]  ;;  %v49_v26 = vld [vmem:[%s1748_s0 + $0x80] sm:$0xff] }
   0xe   :  { %v1360_v22 = vld [vmem:[#allocation3] sm:$0xff]  ;;  %v47_v23 = vld [vmem:[%s1748_s0 + $0x70] sm:$0xff]  ;;  %v48_v24 = vld [vmem:[%s1748_s0 + $0x78] sm:$0xff] }
   0xf   :  { %458 = vmatpush.bf16.msra.mxu1 %v1366_v13  ;;  %1401 = vmatpush.bf16.msra.mxu3 %v1366_v13  ;;  %v50_v30 = vld [vmem:[%s1748_s0 + $0x88] sm:$0xff]  ;;  %v51_v38 = vld [vmem:[%s1748_s0 + $0x90] sm:$0xff]  ;;  %v52_v41 = vld [vmem:[%s1748_s0 + $0x98] sm:$0xff] }
  0x10   :  { %1169 = vmatmul.msk.f32.gmra.mxu0 %vm66_vm1, %v34_v2  ;;  %v53_v49 = vld [vmem:[%s1748_s0 + $0xa0] sm:$0xff]  ;;  %v54_v52 = vld [vmem:[%s1748_s0 + $0xa8] sm:$0xff]  ;;  %v55_v60 = vld [vmem:[%s1748_s0 + $0xb0] sm:$0xff] }
  0x11   :  { %v56_v63 = vld [vmem:[%s1748_s0 + $0xb8] sm:$0xff]  ;;  %v58_v11 = vld [vmem:[%s1748_s0 + $0xc8] sm:$0xff] }
  0x13   :  { %459 = vmatpush.bf16.msra.mxu1 %v1365_v14  ;;  %1402 = vmatpush.bf16.msra.mxu3 %v1365_v14 }
  0x17   :  { %460 = vmatpush.bf16.msra.mxu1 %v1364_v16  ;;  %1403 = vmatpush.bf16.msra.mxu3 %v1364_v16 }
  0x18   :  { %1170 = vmatmul.msk.f32.gmra.mxu0 %vm66_vm1, %v35_v3 }
  0x1b   :  { %461 = vmatpush.bf16.msra.mxu1 %v1363_v17  ;;  %1404 = vmatpush.bf16.msra.mxu3 %v1363_v17 }
  0x1f   :  { %462 = vmatpush.bf16.msra.mxu1 %v1362_v19  ;;  %1405 = vmatpush.bf16.msra.mxu3 %v1362_v19  ;;  %v59_v19 = vld [vmem:[%s1748_s0 + $0xd0] sm:$0xff] }
  0x20   :  { %1171 = vmatmul.msk.f32.gmra.mxu0 %vm66_vm1, %v36_v4 }
  0x23   :  { %463 = vmatpush.bf16.msra.mxu1 %v1361_v20  ;;  %1406 = vmatpush.bf16.msra.mxu3 %v1361_v20 }
  0x27   :  { %464 = vmatpush.bf16.msra.mxu1 %v1360_v22  ;;  %1407 = vmatpush.bf16.msra.mxu3 %v1360_v22  ;;  %v60_v22 = vld [vmem:[%s1748_s0 + $0xd8] sm:$0xff] }
  0x28   :  { %1172 = vmatmul.msk.f32.gmra.mxu0 %vm66_vm1, %v37_v5 }
  0x30   :  { %1173 = vmatmul.msk.f32.gmra.mxu0 %vm66_vm1, %v38_v6 }
  0x38   :  { %1174 = vmatmul.msk.f32.gmra.mxu0 %vm66_vm1, %v39_v7 }
  0x40   :  { %1175 = vmatmul.msk.f32.gmra.mxu0 %vm66_vm1, %v40_v8  ;;  %v57_v8 = vld [vmem:[%s1748_s0 + $0xc0] sm:$0xff] }
  0x48   :  { %1176 = vmatmul.msk.f32.gmra.mxu0 %vm66_vm1, %v41_v9 }
  0x50   :  { %1177 = vmatmul.msk.f32.gmra.mxu0 %vm66_vm1, %v42_v10 }
  0x58   :  { %1178 = vmatmul.msk.f32.gmra.mxu0 %vm66_vm1, %v43_v12 }
  0x60   :  { %1179 = vmatmul.msk.f32.gmra.mxu0 %vm66_vm1, %v44_v15 }
  0x68   :  { %1180 = vmatmul.msk.f32.gmra.mxu0 %vm66_vm1, %v45_v18 }
  0x70   :  { %1181 = vmatmul.msk.f32.gmra.mxu0 %vm66_vm1, %v46_v21 }
  0x78   :  { %1182 = vmatmul.msk.f32.gmra.mxu0 %vm66_vm1, %v47_v23 }
  0x80   :  { %1183 = vmatmul.msk.f32.gmra.mxu0 %vm66_vm1, %v48_v24 }
  0x85   :  { %v184_v25 = vpop.f32.mrf.mxu0 }
  0x86   :  { %v185_v28 = vadd.f32 %v184_v25, %v1574_v27 }
  0x88   :  { %1184 = vmatmul.msk.f32.gmra.mxu0 %vm66_vm1, %v49_v26  ;;  %v312_v31 = vmul.f32 0.01, %v185_v28  ;;  %vm280_vm2 = vcmp.gt.f32.partialorder %v185_v28, 0.0  ;;  %v1375_v26 = vld [vmem:[#allocation3 + $0x78] sm:$0xff] }
  0x89   :  { %724 = vmatpush.bf16.msra.mxu2 %v1375_v26  ;;  %1408 = vmatpush.bf16.msrb.mxu3 %v1375_v26 }
  0x8a   :  { %v344_v34 = vsel %vm280_vm2, %v185_v28, %v312_v31 }
  0x8d   :  { %v187_v29 = vpop.f32.mrf.mxu0 }
  0x8e   :  { %v188_v32 = vadd.f32 %v187_v29, %v1574_v27 }
  0x90   :  { %v313_v33 = vmul.f32 0.01, %v188_v32  ;;  %1185 = vmatmul.msk.f32.gmra.mxu0 %vm66_vm1, %v50_v30  ;;  %vm281_vm3 = vcmp.gt.f32.partialorder %v188_v32, 0.0 }
  0x92   :  { %v345_v35 = vsel %vm281_vm3, %v188_v32, %v313_v33  ;;  %v61_v32 = vld [vmem:[%s1748_s0 + $0xe0] sm:$0xff]  ;;  %v1374_v33 = vld [vmem:[#allocation3 + $0x70] sm:$0xff] }
  0x93   :  { %v376_v36 = vpack.c.bf16 %v345_v35, %v344_v34  ;;  %725 = vmatpush.bf16.msra.mxu2 %v1374_v33  ;;  %1409 = vmatpush.bf16.msrb.mxu3 %v1374_v33  ;;  %v1373_v34 = vld [vmem:[#allocation3 + $0x68] sm:$0xff] }
  0x95   :  { %v190_v37 = vpop.f32.mrf.mxu0  ;;  %465 = vmatmul.bf16.vlgmr.msra.gmra.mxu1 %v376_v36 }
  0x96   :  { %v191_v39 = vadd.f32 %v190_v37, %v1574_v27  ;;  %v62_v37 = vld [vmem:[%s1748_s0 + $0xe8] sm:$0xff] }
  0x97   :  { %726 = vmatpush.bf16.msra.mxu2 %v1373_v34  ;;  %1410 = vmatpush.bf16.msrb.mxu3 %v1373_v34 }
  0x98   :  { %1186 = vmatmul.msk.f32.gmra.mxu0 %vm66_vm1, %v51_v38  ;;  %v314_v42 = vmul.f32 0.01, %v191_v39  ;;  %vm282_vm4 = vcmp.gt.f32.partialorder %v191_v39, 0.0  ;;  %v1372_v38 = vld [vmem:[#allocation3 + $0x60] sm:$0xff] }
  0x9a   :  { %v346_v45 = vsel %vm282_vm4, %v191_v39, %v314_v42  ;;  %v1371_v42 = vld [vmem:[#allocation3 + $0x58] sm:$0xff] }
  0x9b   :  { %727 = vmatpush.bf16.msra.mxu2 %v1372_v38  ;;  %1411 = vmatpush.bf16.msrb.mxu3 %v1372_v38 }
  0x9d   :  { %v193_v40 = vpop.f32.mrf.mxu0 }
  0x9e   :  { %v194_v43 = vadd.f32 %v193_v40, %v1574_v27 }
  0x9f   :  { %728 = vmatpush.bf16.msra.mxu2 %v1371_v42  ;;  %1412 = vmatpush.bf16.msrb.mxu3 %v1371_v42 }
  0xa0   :  { %v315_v44 = vmul.f32 0.01, %v194_v43  ;;  %1187 = vmatmul.msk.f32.gmra.mxu0 %vm66_vm1, %v52_v41  ;;  %vm283_vm5 = vcmp.gt.f32.partialorder %v194_v43, 0.0 }
  0xa2   :  { %v347_v46 = vsel %vm283_vm5, %v194_v43, %v315_v44 }
  0xa3   :  { %v377_v47 = vpack.c.bf16 %v347_v46, %v346_v45 }
  0xa5   :  { %v196_v48 = vpop.f32.mrf.mxu0  ;;  %470 = vmatmul.bf16.gmra.mxu1 %v377_v47  ;;  %v63_v47 = vld [vmem:[%s1748_s0 + $0xf0] sm:$0xff] }
  0xa6   :  { %v197_v50 = vadd.f32 %v196_v48, %v1574_v27  ;;  %v1370_v48 = vld [vmem:[#allocation3 + $0x50] sm:$0xff] }
  0xa7   :  { %729 = vmatpush.bf16.msra.mxu2 %v1370_v48  ;;  %1413 = vmatpush.bf16.msrb.mxu3 %v1370_v48 }
  0xa8   :  { %1188 = vmatmul.msk.f32.gmra.mxu0 %vm66_vm1, %v53_v49  ;;  %v316_v53 = vmul.f32 0.01, %v197_v50  ;;  %vm284_vm6 = vcmp.gt.f32.partialorder %v197_v50, 0.0  ;;  %v1369_v49 = vld [vmem:[#allocation3 + $0x48] sm:$0xff] }
  0xaa   :  { %v348_v56 = vsel %vm284_vm6, %v197_v50, %v316_v53  ;;  %v1368_v53 = vld [vmem:[#allocation3 + $0x40] sm:$0xff] }
  0xab   :  { %730 = vmatpush.bf16.msra.mxu2 %v1369_v49  ;;  %1414 = vmatpush.bf16.msrb.mxu3 %v1369_v49 }
  0xad   :  { %v199_v51 = vpop.f32.mrf.mxu0 }
  0xae   :  { %v200_v54 = vadd.f32 %v199_v51, %v1574_v27 }
  0xaf   :  { %731 = vmatpush.bf16.msra.mxu2 %v1368_v53  ;;  %1415 = vmatpush.bf16.msrb.mxu3 %v1368_v53 }
  0xb0   :  { %v317_v55 = vmul.f32 0.01, %v200_v54  ;;  %1189 = vmatmul.msk.f32.gmra.mxu0 %vm66_vm1, %v54_v52  ;;  %vm285_vm7 = vcmp.gt.f32.partialorder %v200_v54, 0.0  ;;  %v64_v52 = vld [vmem:[%s1748_s0 + $0xf8] sm:$0xff] }
  0xb2   :  { %v349_v57 = vsel %vm285_vm7, %v200_v54, %v317_v55 }
  0xb3   :  { %v378_v58 = vpack.c.bf16 %v349_v57, %v348_v56 }
  0xb5   :  { %v202_v59 = vpop.f32.mrf.mxu0  ;;  %475 = vmatmul.bf16.gmra.mxu1 %v378_v58 }
  0xb6   :  { %v203_v61 = vadd.f32 %v202_v59, %v1574_v27 }
  0xb8   :  { %1190 = vmatmul.msk.f32.gmra.mxu0 %vm66_vm1, %v55_v60  ;;  %v318_v1 = vmul.f32 0.01, %v203_v61  ;;  %vm286_vm8 = vcmp.gt.f32.partialorder %v203_v61, 0.0 }
  0xba   :  { %v350_v4 = vsel %vm286_vm8, %v203_v61, %v318_v1 }
  0xbd   :  { %v205_v62 = vpop.f32.mrf.mxu0 }
  0xbe   :  { %v206_v2 = vadd.f32 %v205_v62, %v1574_v27 }
  0xc0   :  { %v319_v3 = vmul.f32 0.01, %v206_v2  ;;  %1191 = vmatmul.msk.f32.gmra.mxu0 %vm66_vm1, %v56_v63  ;;  %vm287_vm9 = vcmp.gt.f32.partialorder %v206_v2, 0.0 }
  0xc2   :  { %v351_v5 = vsel %vm287_vm9, %v206_v2, %v319_v3 }
  0xc3   :  { %v379_v6 = vpack.c.bf16 %v351_v5, %v350_v4 }
  0xc5   :  { %v208_v7 = vpop.f32.mrf.mxu0  ;;  %480 = vmatmul.bf16.gmra.mxu1 %v379_v6  ;;  %v1656_v6 = vperm.slane %v1503_v0, 4 }
  0xc6   :  { %v209_v9 = vadd.f32 %v208_v7, %v1574_v27 }
  0xc8   :  { %1192 = vmatmul.msk.f32.gmra.mxu0 %vm66_vm1, %v57_v8  ;;  %v320_v12 = vmul.f32 0.01, %v209_v9  ;;  %vm288_vm10 = vcmp.gt.f32.partialorder %v209_v9, 0.0 }
  0xca   :  { %v352_v15 = vsel %vm288_vm10, %v209_v9, %v320_v12 }
  0xcd   :  { %v211_v10 = vpop.f32.mrf.mxu0 }
  0xce   :  { %v212_v13 = vadd.f32 %v211_v10, %v1574_v27 }
  0xd0   :  { %v321_v14 = vmul.f32 0.01, %v212_v13  ;;  %1193 = vmatmul.msk.f32.gmra.mxu0 %vm66_vm1, %v58_v11  ;;  %vm289_vm11 = vcmp.gt.f32.partialorder %v212_v13, 0.0 }
  0xd2   :  { %v353_v16 = vsel %vm289_vm11, %v212_v13, %v321_v14 }
  0xd3   :  { %v380_v17 = vpack.c.bf16 %v353_v16, %v352_v15 }
  0xd5   :  { %v214_v18 = vpop.f32.mrf.mxu0  ;;  %485 = vmatmul.bf16.gmra.mxu1 %v380_v17 }
  0xd6   :  { %v215_v20 = vadd.f32 %v214_v18, %v1574_v27 }
  0xd8   :  { %1194 = vmatmul.msk.f32.gmra.mxu0 %vm66_vm1, %v59_v19  ;;  %v322_v23 = vmul.f32 0.01, %v215_v20  ;;  %vm290_vm12 = vcmp.gt.f32.partialorder %v215_v20, 0.0 }
  0xda   :  { %v354_v28 = vsel %vm290_vm12, %v215_v20, %v322_v23 }
  0xdd   :  { %v217_v21 = vpop.f32.mrf.mxu0 }
  0xde   :  { %v218_v24 = vadd.f32 %v217_v21, %v1574_v27 }
  0xe0   :  { %v323_v25 = vmul.f32 0.01, %v218_v24  ;;  %1195 = vmatmul.msk.f32.gmra.mxu0 %vm66_vm1, %v60_v22  ;;  %vm291_vm13 = vcmp.gt.f32.partialorder %v218_v24, 0.0 }
  0xe2   :  { %v355_v29 = vsel %vm291_vm13, %v218_v24, %v323_v25 }
  0xe3   :  { %v381_v30 = vpack.c.bf16 %v355_v29, %v354_v28 }
  0xe5   :  { %v220_v31 = vpop.f32.mrf.mxu0  ;;  %490 = vmatmul.bf16.gmra.mxu1 %v381_v30 }
  0xe6   :  { %v221_v35 = vadd.f32 %v220_v31, %v1574_v27 }
  0xe8   :  { %1196 = vmatmul.msk.f32.gmra.mxu0 %vm66_vm1, %v61_v32  ;;  %v324_v39 = vmul.f32 0.01, %v221_v35  ;;  %vm292_vm14 = vcmp.gt.f32.partialorder %v221_v35, 0.0 }
  0xea   :  { %v356_v43 = vsel %vm292_vm14, %v221_v35, %v324_v39 }
  0xed   :  { %v223_v36 = vpop.f32.mrf.mxu0 }
  0xee   :  { %v224_v40 = vadd.f32 %v223_v36, %v1574_v27 }
  0xf0   :  { %v325_v41 = vmul.f32 0.01, %v224_v40  ;;  %1197 = vmatmul.msk.f32.gmra.mxu0 %vm66_vm1, %v62_v37  ;;  %vm293_vm15 = vcmp.gt.f32.partialorder %v224_v40, 0.0 }
  0xf2   :  { %v357_v44 = vsel %vm293_vm15, %v224_v40, %v325_v41 }
  0xf3   :  { %v382_v45 = vpack.c.bf16 %v357_v44, %v356_v43 }
  0xf5   :  { %v226_v46 = vpop.f32.mrf.mxu0  ;;  %495 = vmatmul.bf16.gmra.mxu1 %v382_v45 }
  0xf6   :  { %v227_v50 = vadd.f32 %v226_v46, %v1574_v27 }
  0xf8   :  { %1198 = vmatmul.msk.f32.gmra.mxu0 %vm66_vm1, %v63_v47  ;;  %v326_v54 = vmul.f32 0.01, %v227_v50  ;;  %vm294_vm0 = vcmp.gt.f32.partialorder %v227_v50, 0.0 }
  0xfa   :  { %v358_v57 = vsel %vm294_vm0, %v227_v50, %v326_v54 }
  0xfd   :  { %v229_v51 = vpop.f32.mrf.mxu0 }
  0xfe   :  { %v230_v55 = vadd.f32 %v229_v51, %v1574_v27 }
 0x100   :  { %v327_v56 = vmul.f32 0.01, %v230_v55  ;;  %1199 = vmatmul.msk.f32.gmra.mxu0 %vm66_vm1, %v64_v52  ;;  %vm295_vm2 = vcmp.gt.f32.partialorder %v230_v55, 0.0 }
 0x102   :  { %v359_v58 = vsel %vm295_vm2, %v230_v55, %v327_v56 }
 0x103   :  { %v383_v59 = vpack.c.bf16 %v359_v58, %v358_v57 }
 0x105   :  { %v232_v60 = vpop.f32.mrf.mxu0  ;;  %500 = vmatmul.bf16.gmra.mxu1 %v383_v59 }
 0x106   :  { %v233_v61 = vadd.f32 %v232_v60, %v1574_v27 }
 0x108   :  { %v328_v63 = vmul.f32 0.01, %v233_v61  ;;  %vm296_vm3 = vcmp.gt.f32.partialorder %v233_v61, 0.0 }
 0x10a   :  { %v360_v4 = vsel %vm296_vm3, %v233_v61, %v328_v63 }
 0x10d   :  { %v235_v62 = vpop.f32.mrf.mxu0 }
 0x10e   :  { %v236_v1 = vadd.f32 %v235_v62, %v1574_v27 }
 0x110   :  { %v329_v2 = vmul.f32 0.01, %v236_v1  ;;  %vm297_vm4 = vcmp.gt.f32.partialorder %v236_v1, 0.0 }
 0x112   :  { %v466_v3 = vpop.f32.mrf.mxu1  ;;  %v361_v5 = vsel %vm297_vm4, %v236_v1, %v329_v2 }
 0x113   :  { %v384_v7 = vpack.c.bf16 %v361_v5, %v360_v4  ;;  %v467_v9 = vadd.f32 %v466_v3, %v1656_v6 }
 0x115   :  { %v238_v8 = vpop.f32.mrf.mxu0  ;;  %505 = vmatmul.bf16.gmra.mxu1 %v384_v7  ;;  %v578_v12 = vmul.f32 0.01, %v467_v9  ;;  %vm546_vm1 = vcmp.gt.f32.partialorder %v467_v9, 0.0 }
 0x116   :  { %v239_v10 = vadd.f32 %v238_v8, %v1574_v27 }
 0x117   :  { %v610_v18 = vsel %vm546_vm1, %v467_v9, %v578_v12 }
 0x118   :  { %v330_v16 = vmul.f32 0.01, %v239_v10  ;;  %vm298_vm6 = vcmp.gt.f32.partialorder %v239_v10, 0.0 }
 0x11a   :  { %v468_v11 = vpop.f32.mrf.mxu1  ;;  %v362_v23 = vsel %vm298_vm6, %v239_v10, %v330_v16 }
 0x11b   :  { %v469_v13 = vadd.f32 %v468_v11, %v1656_v6 }
 0x11d   :  { %v579_v14 = vmul.f32 0.01, %v469_v13  ;;  %v241_v15 = vpop.f32.mrf.mxu0  ;;  %vm547_vm5 = vcmp.gt.f32.partialorder %v469_v13, 0.0 }
 0x11e   :  { %v242_v17 = vadd.f32 %v241_v15, %v1574_v27 }
 0x11f   :  { %v611_v19 = vsel %vm547_vm5, %v469_v13, %v579_v14 }
 0x120   :  { %v331_v20 = vmul.f32 0.01, %v242_v17  ;;  %v642_v21 = vpack.c.bf16 %v611_v19, %v610_v18  ;;  %vm299_vm7 = vcmp.gt.f32.partialorder %v242_v17, 0.0 }
 0x122   :  { %v471_v22 = vpop.f32.mrf.mxu1  ;;  %732 = vmatmul.bf16.vlgmr.msra.gmra.mxu2 %v642_v21  ;;  %v363_v24 = vsel %vm299_vm7, %v242_v17, %v331_v20 }
 0x123   :  { %v385_v25 = vpack.c.bf16 %v363_v24, %v362_v23  ;;  %v472_v28 = vadd.f32 %v471_v22, %v1656_v6 }
 0x125   :  { %v244_v26 = vpop.f32.mrf.mxu0  ;;  %510 = vmatmul.bf16.gmra.mxu1 %v385_v25  ;;  %v580_v31 = vmul.f32 0.01, %v472_v28  ;;  %vm548_vm8 = vcmp.gt.f32.partialorder %v472_v28, 0.0 }
 0x126   :  { %v245_v29 = vadd.f32 %v244_v26, %v1574_v27 }
 0x127   :  { %v612_v37 = vsel %vm548_vm8, %v472_v28, %v580_v31 }
 0x128   :  { %v332_v35 = vmul.f32 0.01, %v245_v29  ;;  %vm300_vm10 = vcmp.gt.f32.partialorder %v245_v29, 0.0 }
 0x12a   :  { %v473_v30 = vpop.f32.mrf.mxu1  ;;  %v364_v42 = vsel %vm300_vm10, %v245_v29, %v332_v35 }
 0x12b   :  { %v474_v32 = vadd.f32 %v473_v30, %v1656_v6 }
 0x12d   :  { %v581_v33 = vmul.f32 0.01, %v474_v32  ;;  %v247_v34 = vpop.f32.mrf.mxu0  ;;  %vm549_vm9 = vcmp.gt.f32.partialorder %v474_v32, 0.0 }
 0x12e   :  { %v248_v36 = vadd.f32 %v247_v34, %v1574_v27 }
 0x12f   :  { %v613_v38 = vsel %vm549_vm9, %v474_v32, %v581_v33 }
 0x130   :  { %v333_v39 = vmul.f32 0.01, %v248_v36  ;;  %v643_v40 = vpack.c.bf16 %v613_v38, %v612_v37  ;;  %vm301_vm11 = vcmp.gt.f32.partialorder %v248_v36, 0.0 }
 0x132   :  { %v476_v41 = vpop.f32.mrf.mxu1  ;;  %737 = vmatmul.bf16.gmra.mxu2 %v643_v40  ;;  %v365_v43 = vsel %vm301_vm11, %v248_v36, %v333_v39 }
 0x133   :  { %v386_v44 = vpack.c.bf16 %v365_v43, %v364_v42  ;;  %v477_v46 = vadd.f32 %v476_v41, %v1656_v6 }
 0x135   :  { %v250_v45 = vpop.f32.mrf.mxu0  ;;  %515 = vmatmul.bf16.gmra.mxu1 %v386_v44  ;;  %v582_v49 = vmul.f32 0.01, %v477_v46  ;;  %vm550_vm12 = vcmp.gt.f32.partialorder %v477_v46, 0.0 }
 0x136   :  { %v251_v47 = vadd.f32 %v250_v45, %v1574_v27 }
 0x137   :  { %v614_v55 = vsel %vm550_vm12, %v477_v46, %v582_v49 }
 0x138   :  { %v334_v53 = vmul.f32 0.01, %v251_v47  ;;  %vm302_vm14 = vcmp.gt.f32.partialorder %v251_v47, 0.0 }
 0x13a   :  { %v478_v48 = vpop.f32.mrf.mxu1  ;;  %v366_v60 = vsel %vm302_vm14, %v251_v47, %v334_v53 }
 0x13b   :  { %v479_v50 = vadd.f32 %v478_v48, %v1656_v6 }
 0x13d   :  { %v583_v51 = vmul.f32 0.01, %v479_v50  ;;  %v253_v52 = vpop.f32.mrf.mxu0  ;;  %vm551_vm13 = vcmp.gt.f32.partialorder %v479_v50, 0.0 }
 0x13e   :  { %v254_v54 = vadd.f32 %v253_v52, %v1574_v27 }
 0x13f   :  { %v615_v56 = vsel %vm551_vm13, %v479_v50, %v583_v51 }
 0x140   :  { %v335_v57 = vmul.f32 0.01, %v254_v54  ;;  %v644_v58 = vpack.c.bf16 %v615_v56, %v614_v55  ;;  %vm303_vm15 = vcmp.gt.f32.partialorder %v254_v54, 0.0 }
 0x142   :  { %v481_v59 = vpop.f32.mrf.mxu1  ;;  %742 = vmatmul.bf16.gmra.mxu2 %v644_v58  ;;  %v367_v61 = vsel %vm303_vm15, %v254_v54, %v335_v57 }
 0x143   :  { %v387_v62 = vpack.c.bf16 %v367_v61, %v366_v60  ;;  %v482_v1 = vadd.f32 %v481_v59, %v1656_v6 }
 0x145   :  { %v256_v63 = vpop.f32.mrf.mxu0  ;;  %520 = vmatmul.bf16.gmra.mxu1 %v387_v62  ;;  %v584_v4 = vmul.f32 0.01, %v482_v1  ;;  %vm552_vm0 = vcmp.gt.f32.partialorder %v482_v1, 0.0 }
 0x146   :  { %v257_v2 = vadd.f32 %v256_v63, %v1574_v27 }
 0x147   :  { %v616_v11 = vsel %vm552_vm0, %v482_v1, %v584_v4 }
 0x148   :  { %v336_v9 = vmul.f32 0.01, %v257_v2  ;;  %vm304_vm3 = vcmp.gt.f32.partialorder %v257_v2, 0.0 }
 0x14a   :  { %v483_v3 = vpop.f32.mrf.mxu1  ;;  %v368_v16 = vsel %vm304_vm3, %v257_v2, %v336_v9 }
 0x14b   :  { %v484_v5 = vadd.f32 %v483_v3, %v1656_v6 }
 0x14d   :  { %v585_v7 = vmul.f32 0.01, %v484_v5  ;;  %v259_v8 = vpop.f32.mrf.mxu0  ;;  %vm553_vm2 = vcmp.gt.f32.partialorder %v484_v5, 0.0 }
 0x14e   :  { %v260_v10 = vadd.f32 %v259_v8, %v1574_v27 }
 0x14f   :  { %v617_v12 = vsel %vm553_vm2, %v484_v5, %v585_v7 }
 0x150   :  { %vm305_vm4 = vcmp.gt.f32.partialorder %v260_v10, 0.0  ;;  %v337_v13 = vmul.f32 0.01, %v260_v10  ;;  %v645_v14 = vpack.c.bf16 %v617_v12, %v616_v11 }
 0x152   :  { %v486_v15 = vpop.f32.mrf.mxu1  ;;  %747 = vmatmul.bf16.gmra.mxu2 %v645_v14  ;;  %v369_v17 = vsel %vm305_vm4, %v260_v10, %v337_v13 }
 0x153   :  { %v388_v18 = vpack.c.bf16 %v369_v17, %v368_v16  ;;  %v487_v20 = vadd.f32 %v486_v15, %v1656_v6 }
 0x155   :  { %v262_v19 = vpop.f32.mrf.mxu0  ;;  %525 = vmatmul.bf16.gmra.mxu1 %v388_v18  ;;  %v586_v23 = vmul.f32 0.01, %v487_v20  ;;  %vm554_vm1 = vcmp.gt.f32.partialorder %v487_v20, 0.0 }
 0x156   :  { %v263_v21 = vadd.f32 %v262_v19, %v1574_v27 }
 0x157   :  { %v618_v30 = vsel %vm554_vm1, %v487_v20, %v586_v23 }
 0x158   :  { %v338_v28 = vmul.f32 0.01, %v263_v21  ;;  %vm306_vm6 = vcmp.gt.f32.partialorder %v263_v21, 0.0 }
 0x15a   :  { %v488_v22 = vpop.f32.mrf.mxu1  ;;  %v370_v35 = vsel %vm306_vm6, %v263_v21, %v338_v28 }
 0x15b   :  { %v489_v24 = vadd.f32 %v488_v22, %v1656_v6 }
 0x15d   :  { %v587_v25 = vmul.f32 0.01, %v489_v24  ;;  %v265_v26 = vpop.f32.mrf.mxu0  ;;  %vm555_vm5 = vcmp.gt.f32.partialorder %v489_v24, 0.0 }
 0x15e   :  { %v266_v29 = vadd.f32 %v265_v26, %v1574_v27 }
 0x15f   :  { %v619_v31 = vsel %vm555_vm5, %v489_v24, %v587_v25 }
 0x160   :  { %v339_v32 = vmul.f32 0.01, %v266_v29  ;;  %v646_v33 = vpack.c.bf16 %v619_v31, %v618_v30  ;;  %vm307_vm7 = vcmp.gt.f32.partialorder %v266_v29, 0.0 }
 0x162   :  { %v491_v34 = vpop.f32.mrf.mxu1  ;;  %752 = vmatmul.bf16.gmra.mxu2 %v646_v33  ;;  %v371_v36 = vsel %vm307_vm7, %v266_v29, %v339_v32  ;;  %v1692_v32 = vperm.slane %v1503_v0, 5 }
 0x163   :  { %v389_v37 = vpack.c.bf16 %v371_v36, %v370_v35  ;;  %v492_v39 = vadd.f32 %v491_v34, %v1656_v6 }
 0x165   :  { %v268_v38 = vpop.f32.mrf.mxu0  ;;  %530 = vmatmul.bf16.vlgmr.msra.gmra.mxu3 %v389_v37  ;;  %v588_v42 = vmul.f32 0.01, %v492_v39  ;;  %vm556_vm8 = vcmp.gt.f32.partialorder %v492_v39, 0.0 }
 0x166   :  { %v269_v40 = vadd.f32 %v268_v38, %v1574_v27 }
 0x167   :  { %v620_v48 = vsel %vm556_vm8, %v492_v39, %v588_v42 }
 0x168   :  { %v340_v46 = vmul.f32 0.01, %v269_v40  ;;  %vm308_vm10 = vcmp.gt.f32.partialorder %v269_v40, 0.0 }
 0x16a   :  { %v493_v41 = vpop.f32.mrf.mxu1  ;;  %v372_v53 = vsel %vm308_vm10, %v269_v40, %v340_v46 }
 0x16b   :  { %v494_v43 = vadd.f32 %v493_v41, %v1656_v6 }
 0x16d   :  { %v589_v44 = vmul.f32 0.01, %v494_v43  ;;  %v271_v45 = vpop.f32.mrf.mxu0  ;;  %vm557_vm9 = vcmp.gt.f32.partialorder %v494_v43, 0.0 }
 0x16e   :  { %v272_v47 = vadd.f32 %v271_v45, %v1574_v27 }
 0x16f   :  { %v621_v49 = vsel %vm557_vm9, %v494_v43, %v589_v44 }
 0x170   :  { %v341_v50 = vmul.f32 0.01, %v272_v47  ;;  %v647_v51 = vpack.c.bf16 %v621_v49, %v620_v48  ;;  %vm309_vm11 = vcmp.gt.f32.partialorder %v272_v47, 0.0 }
 0x172   :  { %v496_v52 = vpop.f32.mrf.mxu1  ;;  %757 = vmatmul.bf16.gmra.mxu2 %v647_v51  ;;  %v373_v54 = vsel %vm309_vm11, %v272_v47, %v341_v50 }
 0x173   :  { %v390_v55 = vpack.c.bf16 %v373_v54, %v372_v53  ;;  %v497_v57 = vadd.f32 %v496_v52, %v1656_v6 }
 0x175   :  { %v274_v56 = vpop.f32.mrf.mxu0  ;;  %535 = vmatmul.bf16.gmra.mxu3 %v390_v55  ;;  %v590_v60 = vmul.f32 0.01, %v497_v57  ;;  %vm558_vm12 = vcmp.gt.f32.partialorder %v497_v57, 0.0 }
 0x176   :  { %v275_v58 = vadd.f32 %v274_v56, %v1574_v27 }
 0x177   :  { %v622_v3 = vsel %vm558_vm12, %v497_v57, %v590_v60 }
 0x178   :  { %v342_v1 = vmul.f32 0.01, %v275_v58  ;;  %vm310_vm14 = vcmp.gt.f32.partialorder %v275_v58, 0.0 }
 0x17a   :  { %v498_v59 = vpop.f32.mrf.mxu1  ;;  %v374_v9 = vsel %vm310_vm14, %v275_v58, %v342_v1 }
 0x17b   :  { %v499_v61 = vadd.f32 %v498_v59, %v1656_v6 }
 0x17d   :  { %v591_v62 = vmul.f32 0.01, %v499_v61  ;;  %v277_v63 = vpop.f32.mrf.mxu0  ;;  %vm559_vm13 = vcmp.gt.f32.partialorder %v499_v61, 0.0 }
 0x17e   :  { %v278_v2 = vadd.f32 %v277_v63, %v1574_v27 }
 0x17f   :  { %v623_v4 = vsel %vm559_vm13, %v499_v61, %v591_v62 }
 0x180   :  { %v343_v5 = vmul.f32 0.01, %v278_v2  ;;  %v648_v7 = vpack.c.bf16 %v623_v4, %v622_v3  ;;  %vm311_vm15 = vcmp.gt.f32.partialorder %v278_v2, 0.0 }
 0x182   :  { %v501_v8 = vpop.f32.mrf.mxu1  ;;  %762 = vmatmul.bf16.gmra.mxu2 %v648_v7  ;;  %v375_v10 = vsel %vm311_vm15, %v278_v2, %v343_v5 }
 0x183   :  { %v391_v11 = vpack.c.bf16 %v375_v10, %v374_v9  ;;  %v502_v12 = vadd.f32 %v501_v8, %v1656_v6 }
 0x185   :  { %540 = vmatmul.bf16.gmra.mxu3 %v391_v11  ;;  %v592_v14 = vmul.f32 0.01, %v502_v12  ;;  %vm560_vm0 = vcmp.gt.f32.partialorder %v502_v12, 0.0 }
 0x187   :  { %v624_v16 = vsel %vm560_vm0, %v502_v12, %v592_v14 }
 0x18a   :  { %v503_v13 = vpop.f32.mrf.mxu1 }
 0x18b   :  { %v504_v15 = vadd.f32 %v503_v13, %v1656_v6 }
 0x18d   :  { %v593_v27 = vmul.f32 0.01, %v504_v15  ;;  %vm561_vm2 = vcmp.gt.f32.partialorder %v504_v15, 0.0 }
 0x18f   :  { %v625_v17 = vsel %vm561_vm2, %v504_v15, %v593_v27 }
 0x190   :  { %v649_v18 = vpack.c.bf16 %v625_v17, %v624_v16 }
 0x192   :  { %v506_v19 = vpop.f32.mrf.mxu1  ;;  %767 = vmatmul.bf16.gmra.mxu2 %v649_v18 }
 0x193   :  { %v507_v20 = vadd.f32 %v506_v19, %v1656_v6 }
 0x195   :  { %v594_v22 = vmul.f32 0.01, %v507_v20  ;;  %vm562_vm3 = vcmp.gt.f32.partialorder %v507_v20, 0.0 }
 0x197   :  { %v626_v25 = vsel %vm562_vm3, %v507_v20, %v594_v22  ;;  %vm873_vm3 = vcmask 1041409  }
 0x19a   :  { %v508_v21 = vpop.f32.mrf.mxu1 }
 0x19b   :  { %v509_v23 = vadd.f32 %v508_v21, %v1656_v6 }
 0x19d   :  { %v595_v24 = vmul.f32 0.01, %v509_v23  ;;  %vm563_vm4 = vcmp.gt.f32.partialorder %v509_v23, 0.0 }
 0x19f   :  { %v627_v26 = vsel %vm563_vm4, %v509_v23, %v595_v24  ;;  %vm875_vm4 = vcmask 1042434  }
 0x1a0   :  { %v650_v28 = vpack.c.bf16 %v627_v26, %v626_v25 }
 0x1a2   :  { %v511_v29 = vpop.f32.mrf.mxu1  ;;  %772 = vmatmul.bf16.gmra.mxu2 %v650_v28 }
 0x1a3   :  { %v512_v31 = vadd.f32 %v511_v29, %v1656_v6 }
 0x1a5   :  { %v733_v30 = vpop.f32.mrf.mxu2  ;;  %v596_v34 = vmul.f32 0.01, %v512_v31  ;;  %vm564_vm1 = vcmp.gt.f32.partialorder %v512_v31, 0.0 }
 0x1a6   :  { %v734_v38 = vadd.f32 %v733_v30, %v1692_v32 }
 0x1a7   :  { %v628_v40 = vsel %vm564_vm1, %v512_v31, %v596_v34  ;;  %vm877_vm1 = vcmask 1043459  }
 0x1aa   :  { %v513_v33 = vpop.f32.mrf.mxu1 }
 0x1ab   :  { %v514_v35 = vadd.f32 %v513_v33, %v1656_v6 }
 0x1ad   :  { %v597_v36 = vmul.f32 0.01, %v514_v35  ;;  %v735_v37 = vpop.f32.mrf.mxu2  ;;  %vm565_vm5 = vcmp.gt.f32.partialorder %v514_v35, 0.0 }
 0x1ae   :  { %v736_v39 = vadd.f32 %v735_v37, %v1692_v32 }
 0x1af   :  { %v629_v41 = vsel %vm565_vm5, %v514_v35, %v597_v36 }
 0x1b0   :  { %v813_v42 = vmax.f32 %v734_v38, %v736_v39  ;;  %v651_v43 = vpack.c.bf16 %v629_v41, %v628_v40 }
 0x1b2   :  { %v516_v44 = vpop.f32.mrf.mxu1  ;;  %777 = vmatmul.bf16.gmra.mxu2 %v651_v43 }
 0x1b3   :  { %v517_v46 = vadd.f32 %v516_v44, %v1656_v6 }
 0x1b5   :  { %v738_v0 = vpop.f32.mrf.mxu2  ;;  %v598_v49 = vmul.f32 0.01, %v517_v46  ;;  %vm566_vm6 = vcmp.gt.f32.partialorder %v517_v46, 0.0 }
 0x1b6   :  { %v739_v45 = vadd.f32 %v738_v0, %v1692_v32 }
 0x1b7   :  { %v630_v54 = vsel %vm566_vm6, %v517_v46, %v598_v49 }
 0x1b8   :  { %v814_v47 = vmax.f32 %v813_v42, %v739_v45 }
 0x1ba   :  { %v518_v48 = vpop.f32.mrf.mxu1 }
 0x1bb   :  { %v519_v50 = vadd.f32 %v518_v48, %v1656_v6 }
 0x1bd   :  { %v599_v51 = vmul.f32 0.01, %v519_v50  ;;  %v740_v52 = vpop.f32.mrf.mxu2  ;;  %vm567_vm7 = vcmp.gt.f32.partialorder %v519_v50, 0.0 }
 0x1be   :  { %v741_v53 = vadd.f32 %v740_v52, %v1692_v32 }
 0x1bf   :  { %v631_v55 = vsel %vm567_vm7, %v519_v50, %v599_v51 }
 0x1c0   :  { %v815_v56 = vmax.f32 %v814_v47, %v741_v53  ;;  %v652_v57 = vpack.c.bf16 %v631_v55, %v630_v54 }
 0x1c2   :  { %v521_v58 = vpop.f32.mrf.mxu1  ;;  %782 = vmatmul.bf16.gmra.mxu2 %v652_v57 }
 0x1c3   :  { %v522_v61 = vadd.f32 %v521_v58, %v1656_v6 }
 0x1c5   :  { %v743_v59 = vpop.f32.mrf.mxu2  ;;  %v600_v1 = vmul.f32 0.01, %v522_v61  ;;  %vm568_vm8 = vcmp.gt.f32.partialorder %v522_v61, 0.0 }
 0x1c6   :  { %v744_v60 = vadd.f32 %v743_v59, %v1692_v32 }
 0x1c7   :  { %v632_v7 = vsel %vm568_vm8, %v522_v61, %v600_v1 }
 0x1c8   :  { %v816_v62 = vmax.f32 %v815_v56, %v744_v60 }
 0x1ca   :  { %v523_v63 = vpop.f32.mrf.mxu1 }
 0x1cb   :  { %v524_v2 = vadd.f32 %v523_v63, %v1656_v6 }
 0x1cd   :  { %v601_v3 = vmul.f32 0.01, %v524_v2  ;;  %v745_v4 = vpop.f32.mrf.mxu2  ;;  %vm569_vm9 = vcmp.gt.f32.partialorder %v524_v2, 0.0 }
 0x1ce   :  { %v746_v5 = vadd.f32 %v745_v4, %v1692_v32 }
 0x1cf   :  { %v633_v8 = vsel %vm569_vm9, %v524_v2, %v601_v3 }
 0x1d0   :  { %v817_v9 = vmax.f32 %v816_v62, %v746_v5  ;;  %v653_v10 = vpack.c.bf16 %v633_v8, %v632_v7 }
 0x1d2   :  { %v526_v11 = vpop.f32.mrf.mxu1  ;;  %787 = vmatmul.bf16.gmra.mxu2 %v653_v10 }
 0x1d3   :  { %v527_v14 = vadd.f32 %v526_v11, %v1656_v6 }
 0x1d5   :  { %v748_v12 = vpop.f32.mrf.mxu2  ;;  %v602_v16 = vmul.f32 0.01, %v527_v14  ;;  %vm570_vm10 = vcmp.gt.f32.partialorder %v527_v14, 0.0 }
 0x1d6   :  { %v749_v13 = vadd.f32 %v748_v12, %v1692_v32 }
 0x1d7   :  { %v634_v21 = vsel %vm570_vm10, %v527_v14, %v602_v16 }
 0x1d8   :  { %v818_v15 = vmax.f32 %v817_v9, %v749_v13 }
 0x1da   :  { %v528_v27 = vpop.f32.mrf.mxu1 }
 0x1db   :  { %v529_v17 = vadd.f32 %v528_v27, %v1656_v6 }
 0x1dd   :  { %vm571_vm11 = vcmp.gt.f32.partialorder %v529_v17, 0.0  ;;  %v603_v18 = vmul.f32 0.01, %v529_v17  ;;  %v750_v19 = vpop.f32.mrf.mxu2 }
 0x1de   :  { %v751_v20 = vadd.f32 %v750_v19, %v1692_v32 }
 0x1df   :  { %v635_v22 = vsel %vm571_vm11, %v529_v17, %v603_v18 }
 0x1e0   :  { %v819_v23 = vmax.f32 %v818_v15, %v751_v20  ;;  %v654_v24 = vpack.c.bf16 %v635_v22, %v634_v21 }
 0x1e2   :  { %792 = vmatmul.bf16.gmra.mxu2 %v654_v24  ;;  %v820_v10 = vrot.slane %v819_v23, 4 }
 0x1e4   :  { %v821_v12 = vmax.f32 %v819_v23, %v820_v10  ;;  %v1376_v10 = vld [vmem:[#allocation3 + $0x80] sm:$0xff] }
 0x1e5   :  { %v753_v25 = vpop.f32.mrf.mxu2 }
 0x1e6   :  { %v754_v30 = vadd.f32 %v753_v25, %v1692_v32  ;;  %v822_v15 = vrot.slane %v821_v12, 2 }
 0x1e8   :  { %v531_v26 = vpop.f32.mrf.mxu3 }
 0x1e9   :  { %v532_v28 = vadd.f32 %v531_v26, %v1656_v6 }
 0x1eb   :  { %v604_v35 = vmul.f32 0.01, %v532_v28  ;;  %vm572_vm12 = vcmp.gt.f32.partialorder %v532_v28, 0.0 }
 0x1ed   :  { %v755_v29 = vpop.f32.mrf.mxu2  ;;  %v636_v39 = vsel %vm572_vm12, %v532_v28, %v604_v35 }
 0x1ee   :  { %v756_v31 = vadd.f32 %v755_v29, %v1692_v32 }
 0x1f0   :  { %v826_v33 = vmax.f32 %v754_v30, %v756_v31  ;;  %v533_v34 = vpop.f32.mrf.mxu3 }
 0x1f1   :  { %v534_v36 = vadd.f32 %v533_v34, %v1656_v6 }
 0x1f3   :  { %vm573_vm13 = vcmp.gt.f32.partialorder %v534_v36, 0.0  ;;  %v605_v37 = vmul.f32 0.01, %v534_v36 }
 0x1f5   :  { %v758_v38 = vpop.f32.mrf.mxu2  ;;  %v637_v40 = vsel %vm573_vm13, %v534_v36, %v605_v37 }
 0x1f6   :  { %v759_v41 = vadd.f32 %v758_v38, %v1692_v32  ;;  %v655_v42 = vpack.c.bf16 %v637_v40, %v636_v39 }
 0x1f8   :  { %v827_v43 = vmax.f32 %v826_v33, %v759_v41  ;;  %v536_v44 = vpop.f32.mrf.mxu3  ;;  %797 = vmatmul.bf16.vlgmr.msrb.gmra.mxu3 %v655_v42 }
 0x1f9   :  { %v537_v0 = vadd.f32 %v536_v44, %v1656_v6 }
 0x1fb   :  { %v606_v49 = vmul.f32 0.01, %v537_v0  ;;  %vm574_vm14 = vcmp.gt.f32.partialorder %v537_v0, 0.0 }
 0x1fd   :  { %v760_v45 = vpop.f32.mrf.mxu2  ;;  %v638_v53 = vsel %vm574_vm14, %v537_v0, %v606_v49 }
 0x1fe   :  { %v761_v46 = vadd.f32 %v760_v45, %v1692_v32 }
 0x200   :  { %v828_v47 = vmax.f32 %v827_v43, %v761_v46  ;;  %v538_v48 = vpop.f32.mrf.mxu3 }
 0x201   :  { %v539_v50 = vadd.f32 %v538_v48, %v1656_v6 }
 0x203   :  { %v607_v51 = vmul.f32 0.01, %v539_v50  ;;  %vm575_vm15 = vcmp.gt.f32.partialorder %v539_v50, 0.0 }
 0x205   :  { %v763_v52 = vpop.f32.mrf.mxu2  ;;  %v639_v54 = vsel %vm575_vm15, %v539_v50, %v607_v51 }
 0x206   :  { %v764_v55 = vadd.f32 %v763_v52, %v1692_v32  ;;  %v656_v56 = vpack.c.bf16 %v639_v54, %v638_v53 }
 0x208   :  { %v829_v57 = vmax.f32 %v828_v47, %v764_v55  ;;  %v541_v58 = vpop.f32.mrf.mxu3  ;;  %802 = vmatmul.bf16.gmra.mxu3 %v656_v56  ;;  %v1383_v56 = vld [vmem:[#allocation3 + $0xb8] sm:$0xff] }
 0x209   :  { %v542_v59 = vadd.f32 %v541_v58, %v1656_v6  ;;  %970 = vmatpush.bf16.msra.mxu3 %v1383_v56 }
 0x20b   :  { %v608_v1 = vmul.f32 0.01, %v542_v59  ;;  %vm576_vm0 = vcmp.gt.f32.partialorder %v542_v59, 0.0 }
 0x20d   :  { %v765_v60 = vpop.f32.mrf.mxu2  ;;  %v640_v5 = vsel %vm576_vm0, %v542_v59, %v608_v1  ;;  %v1381_v59 = vld [vmem:[#allocation3 + $0xa8] sm:$0xff]  ;;  %v1379_v1 = vld [vmem:[#allocation3 + $0x98] sm:$0xff] }
 0x20e   :  { %v766_v61 = vadd.f32 %v765_v60, %v1692_v32  ;;  %v1380_v60 = vld [vmem:[#allocation3 + $0xa0] sm:$0xff] }
 0x210   :  { %v830_v62 = vmax.f32 %v829_v57, %v766_v61  ;;  %v543_v63 = vpop.f32.mrf.mxu3  ;;  %v1382_v57 = vld [vmem:[#allocation3 + $0xb0] sm:$0xff] }
 0x211   :  { %v544_v2 = vadd.f32 %v543_v63, %v1656_v6  ;;  %v823_v6 = vmax.f32 %v821_v12, %v822_v15  ;;  %971 = vmatpush.bf16.msra.mxu3 %v1382_v57 }
 0x213   :  { %v609_v3 = vmul.f32 0.01, %v544_v2  ;;  %vm577_vm2 = vcmp.gt.f32.partialorder %v544_v2, 0.0  ;;  %v824_v20 = vrot.slane %v823_v6, 1 }
 0x215   :  { %v768_v4 = vpop.f32.mrf.mxu2  ;;  %v641_v7 = vsel %vm577_vm2, %v544_v2, %v609_v3  ;;  %v825_v24 = vmax.f32 %v823_v6, %v824_v20  ;;  %972 = vmatpush.bf16.msra.mxu3 %v1381_v59  ;;  %v1378_v2 = vld [vmem:[#allocation3 + $0x90] sm:$0xff]  ;;  %v1391_v6 = vld [vmem:[#allocation3 + $0xf8] sm:$0xff] }
 0x216   :  { %v769_v8 = vadd.f32 %v768_v4, %v1692_v32  ;;  %v657_v9 = vpack.c.bf16 %v641_v7, %v640_v5  ;;  %v1377_v5 = vld [vmem:[#allocation3 + $0x88] sm:$0xff] }
 0x218   :  { %v831_v11 = vmax.f32 %v830_v62, %v769_v8  ;;  %807 = vmatmul.bf16.gmra.mxu3 %v657_v9 }
 0x219   :  { %973 = vmatpush.bf16.msra.mxu3 %v1380_v60 }
 0x21d   :  { %v770_v13 = vpop.f32.mrf.mxu2  ;;  %974 = vmatpush.bf16.msra.mxu3 %v1379_v1 }
 0x21e   :  { %v771_v14 = vadd.f32 %v770_v13, %v1692_v32 }
 0x220   :  { %v832_v27 = vmax.f32 %v831_v11, %v771_v14 }
 0x221   :  { %975 = vmatpush.bf16.msra.mxu3 %v1378_v2 }
 0x222   :  { %v833_v16 = vrot.slane %v832_v27, 4 }
 0x224   :  { %v834_v17 = vmax.f32 %v832_v27, %v833_v16 }
 0x225   :  { %v773_v18 = vpop.f32.mrf.mxu2  ;;  %976 = vmatpush.bf16.msra.mxu3 %v1377_v5 }
 0x226   :  { %v835_v19 = vrot.slane %v834_v17, 2  ;;  %v774_v34 = vadd.f32 %v773_v18, %v1692_v32 }
 0x228   :  { %v836_v21 = vmax.f32 %v834_v17, %v835_v19  ;;  %v1390_v19 = vld [vmem:[#allocation3 + $0xf0] sm:$0xff] }
 0x229   :  { %977 = vmatpush.bf16.msra.mxu3 %v1376_v10 }
 0x22a   :  { %v837_v22 = vrot.slane %v836_v21, 1 }
 0x22c   :  { %v838_v25 = vmax.f32 %v836_v21, %v837_v22 }
 0x22d   :  { %v775_v26 = vpop.f32.mrf.mxu2  ;;  %1053 = vmatpush.bf16.msrb.mxu3 %v1391_v6 }
 0x22e   :  { %v874_v28 = vsel %vm873_vm3, %v838_v25, %v825_v24  ;;  %v776_v33 = vadd.f32 %v775_v26, %v1692_v32  ;;  %v1389_v25 = vld [vmem:[#allocation3 + $0xe8] sm:$0xff] }
 0x230   :  { %v839_v36 = vmax.f32 %v774_v34, %v776_v33 }
 0x231   :  { %1054 = vmatpush.bf16.msrb.mxu3 %v1390_v19 }
 0x235   :  { %v778_v29 = vpop.f32.mrf.mxu2  ;;  %1055 = vmatpush.bf16.msrb.mxu3 %v1389_v25 }
 0x236   :  { %v779_v35 = vadd.f32 %v778_v29, %v1692_v32  ;;  %v1388_v29 = vld [vmem:[#allocation3 + $0xe0] sm:$0xff] }
 0x238   :  { %v840_v39 = vmax.f32 %v839_v36, %v779_v35  ;;  %v1386_v35 = vld [vmem:[#allocation3 + $0xd0] sm:$0xff] }
 0x239   :  { %1056 = vmatpush.bf16.msrb.mxu3 %v1388_v29 }
 0x23d   :  { %v780_v23 = vpop.f32.mrf.mxu2 }
 0x23e   :  { %v781_v37 = vadd.f32 %v780_v23, %v1692_v32 }
 0x240   :  { %v841_v41 = vmax.f32 %v840_v39, %v781_v37  ;;  %v1385_v39 = vld [vmem:[#allocation3 + $0xc8] sm:$0xff] }
 0x245   :  { %v783_v30 = vpop.f32.mrf.mxu2 }
 0x246   :  { %v784_v40 = vadd.f32 %v783_v30, %v1692_v32 }
 0x248   :  { %v842_v43 = vmax.f32 %v841_v41, %v784_v40  ;;  %v1384_v40 = vld [vmem:[#allocation3 + $0xc0] sm:$0xff]  ;;  %v1399_v41 = vld [vmem:[#allocation3 + $0x138] sm:$0xff] }
 0x24d   :  { %v785_v31 = vpop.f32.mrf.mxu2 }
 0x24e   :  { %v786_v42 = vadd.f32 %v785_v31, %v1692_v32  ;;  %v1387_v31 = vld [vmem:[#allocation3 + $0xd8] sm:$0xff] }
 0x24f   :  { %1057 = vmatpush.bf16.msrb.mxu3 %v1387_v31 }
 0x250   :  { %v843_v0 = vmax.f32 %v842_v43, %v786_v42  ;;  %v1398_v42 = vld [vmem:[#allocation3 + $0x130] sm:$0xff]  ;;  %v1397_v43 = vld [vmem:[#allocation3 + $0x128] sm:$0xff] }
 0x253   :  { %1058 = vmatpush.bf16.msrb.mxu3 %v1386_v35 }
 0x255   :  { %v788_v38 = vpop.f32.mrf.mxu2 }
 0x256   :  { %v789_v44 = vadd.f32 %v788_v38, %v1692_v32 }
 0x257   :  { %1059 = vmatpush.bf16.msrb.mxu3 %v1385_v39 }
 0x258   :  { %v844_v46 = vmax.f32 %v843_v0, %v789_v44  ;;  %v1396_v44 = vld [vmem:[#allocation3 + $0x120] sm:$0xff]  ;;  %v1395_v0 = vld [vmem:[#allocation3 + $0x118] sm:$0xff] }
 0x25b   :  { %1060 = vmatpush.bf16.msrb.mxu3 %v1384_v40 }
 0x25d   :  { %v790_v45 = vpop.f32.mrf.mxu2 }
 0x25e   :  { %v791_v47 = vadd.f32 %v790_v45, %v1692_v32  ;;  %v1394_v45 = vld [vmem:[#allocation3 + $0x110] sm:$0xff] }
 0x260   :  { %v845_v48 = vmax.f32 %v844_v46, %v791_v47  ;;  %v1420_v46 = vld [vmem:[%s1750_s2] sm:$0xff] }
 0x261   :  { %v921_v47 = vperm.slane %v1420_v46, 6  ;;  %v1004_v56 = vperm.slane %v1420_v46, 7 }
 0x262   :  { %v846_v49 = vrot.slane %v845_v48, 4 }
 0x264   :  { %v847_v50 = vmax.f32 %v845_v48, %v846_v49 }
 0x265   :  { %v793_v62 = vpop.f32.mrf.mxu2 }
 0x266   :  { %v848_v51 = vrot.slane %v847_v50, 2  ;;  %v794_v8 = vadd.f32 %v793_v62, %v1692_v32 }
 0x268   :  { %v849_v52 = vmax.f32 %v847_v50, %v848_v51 }
 0x26a   :  { %v850_v53 = vrot.slane %v849_v52, 1 }
 0x26c   :  { %v851_v54 = vmax.f32 %v849_v52, %v850_v53 }
 0x26d   :  { %v795_v3 = vpop.f32.mrf.mxu2 }
 0x26e   :  { %v876_v55 = vsel %vm875_vm4, %v851_v54, %v874_v28  ;;  %v796_v7 = vadd.f32 %v795_v3, %v1692_v32  ;;  %v1393_v54 = vld [vmem:[#allocation3 + $0x108] sm:$0xff] }
 0x270   :  { %v852_v11 = vmax.f32 %v794_v8, %v796_v7 }
 0x27b   :  { %v798_v58 = vpop.f32.mrf.mxu3 }
 0x27c   :  { %v799_v9 = vadd.f32 %v798_v58, %v1692_v32 }
 0x27e   :  { %v853_v14 = vmax.f32 %v852_v11, %v799_v9 }
 0x283   :  { %v800_v61 = vpop.f32.mrf.mxu3 }
 0x284   :  { %v801_v12 = vadd.f32 %v800_v61, %v1692_v32 }
 0x286   :  { %v854_v27 = vmax.f32 %v853_v14, %v801_v12 }
 0x28b   :  { %v803_v63 = vpop.f32.mrf.mxu3 }
 0x28c   :  { %v804_v15 = vadd.f32 %v803_v63, %v1692_v32  ;;  %v32_v63 = vld [vmem:[%s1750_s2 + $0x8] sm:$0xff] }
 0x28d   :  { %v1087_v1 = vperm.slane %v32_v63, 0 }
 0x28e   :  { %v855_v17 = vmax.f32 %v854_v27, %v804_v15 }
 0x293   :  { %v805_v4 = vpop.f32.mrf.mxu3 }
 0x294   :  { %v806_v16 = vadd.f32 %v805_v4, %v1692_v32 }
 0x296   :  { %v856_v20 = vmax.f32 %v855_v17, %v806_v16 }
 0x29b   :  { %v808_v13 = vpop.f32.mrf.mxu3 }
 0x29c   :  { %v809_v18 = vadd.f32 %v808_v13, %v1692_v32 }
 0x29e   :  { %v857_v22 = vmax.f32 %v856_v20, %v809_v18 }
 0x2a3   :  { %v810_v21 = vpop.f32.mrf.mxu3 }
 0x2a4   :  { %v811_v24 = vadd.f32 %v810_v21, %v1692_v32 }
 0x2a6   :  { %v858_v26 = vmax.f32 %v857_v22, %v811_v24 }
 0x2a8   :  { %v859_v28 = vrot.slane %v858_v26, 4 }
 0x2aa   :  { %v860_v23 = vmax.f32 %v858_v26, %v859_v28 }
 0x2ac   :  { %v861_v30 = vrot.slane %v860_v23, 2 }
 0x2ae   :  { %v862_v33 = vmax.f32 %v860_v23, %v861_v30 }
 0x2b0   :  { %v863_v34 = vrot.slane %v862_v33, 1 }
 0x2b2   :  { %v864_v36 = vmax.f32 %v862_v33, %v863_v34 }
 0x2b4   :  { %v878_v37 = vsel %vm877_vm1, %v864_v36, %v876_v55  ;;  %v1392_v55 = vld [vmem:[#allocation3 + $0x100] sm:$0xff] }
 0x2b5   :  { %880 = vst [vmem:[#allocation2] sm:$0xf] %v878_v37 }
 0x2bc   :  { %v902_v32 = vld [vmem:[#allocation2] sm:$0xf] }
 0x2bd   :  { %v903_v38 = vpack.c.bf16 %v902_v32, %v902_v32 }
 0x2bf   :  { %978 = vmatmul.bf16.vlgmr.msra.gmra.mxu3 %v903_v38 }
 0x2c0   :  { %1136 = vmatpush.bf16.msra.mxu3 %v1399_v41 }
 0x2c4   :  { %1137 = vmatpush.bf16.msra.mxu3 %v1398_v42 }
 0x2c8   :  { %1138 = vmatpush.bf16.msra.mxu3 %v1397_v43 }
 0x2cc   :  { %1139 = vmatpush.bf16.msra.mxu3 %v1396_v44 }
 0x2d0   :  { %1140 = vmatpush.bf16.msra.mxu3 %v1395_v0 }
 0x2d4   :  { %1141 = vmatpush.bf16.msra.mxu3 %v1394_v45 }
 0x2d8   :  { %1142 = vmatpush.bf16.msra.mxu3 %v1393_v54 }
 0x2dc   :  { %1143 = vmatpush.bf16.msra.mxu3 %v1392_v55 }
 0x342   :  { %v979_v48 = vpop.f32.mrf.mxu3 }
 0x343   :  { %v980_v49 = vadd.f32 %v979_v48, %v921_v47 }
 0x345   :  { %vm983_vm5 = vcmp.gt.f32.partialorder %v980_v49, 0.0  ;;  %v984_v50 = vmul.f32 0.01, %v980_v49 }
 0x347   :  { %v985_v51 = vsel %vm983_vm5, %v980_v49, %v984_v50 }
 0x348   :  { %v986_v52 = vpack.c.bf16 %v985_v51, %v985_v51 }
 0x34a   :  { %v981_v53 = vpop.f32.mrf.mxu3  ;;  %1061 = vmatmul.bf16.vlgmr.msrb.gmra.mxu3 %v986_v52 }
 0x3cd   :  { %v1062_v57 = vpop.f32.mrf.mxu3 }
 0x3ce   :  { %v1063_v58 = vadd.f32 %v1062_v57, %v1004_v56 }
 0x3d0   :  { %vm1066_vm6 = vcmp.gt.f32.partialorder %v1063_v58, 0.0  ;;  %v1067_v59 = vmul.f32 0.01, %v1063_v58 }
 0x3d2   :  { %v1068_v60 = vsel %vm1066_vm6, %v1063_v58, %v1067_v59 }
 0x3d3   :  { %v1069_v61 = vpack.c.bf16 %v1068_v60, %v1068_v60 }
 0x3d5   :  { %v1064_v62 = vpop.f32.mrf.mxu3  ;;  %1144 = vmatmul.bf16.vlgmr.msra.gmra.mxu3 %v1069_v61 }
 0x458   :  { %v1145_v2 = vpop.f32.mrf.mxu3 }
 0x459   :  { %v1146_v3 = vadd.f32 %v1145_v2, %v1087_v1 }
 0x45b   :  { %1149 = vst [vmem:[#allocation6] sm:$0xf] %v1146_v3 }
 0x45c   :  { %1160 = dma.vmem_to_hbm [thread:$0]  %s1156_s5, 64, %s1158_s8, [#allocation5]  }
 0x460   :  { %v1147_v4 = vpop.f32.mrf.mxu3 }
 0x461   :  { %1471 = dma.done.wait [#allocation5], 64  }
 0x462   :  { %1472 = vsyncadd [#allocation5], 4294967232 }
 0x463   :  { %1165 = vsyncpa [#allocation4], 1 }
 0x464   :  { %1166 = vsyncpa [#allocation5], 1 }

</bundles_post_ra>
